<compile_context>
chip_gen: v7x
topology: tpu7x:2x2x1
jax: 0.10.0
libtpu: 0.0.40
codegen_flags: <defaults>
</compile_context>

<pallas_src>
import jax
import jax.numpy as jnp
from jax.experimental import pallas as pl
from jax.experimental.pallas import tpu as pltpu


def _weibull_kernel(t_ref, k_ref, inv_lam_ref, log_k_over_lam_ref, o_ref):
    t = t_ref[...].astype(jnp.float32)                  # [TB, P]
    k = k_ref[...]                                      # [1, P] f32, broadcasts
    inv_lam = inv_lam_ref[...]                          # [1, P] f32
    log_k_over_lam = log_k_over_lam_ref[...]            # [1, P] f32

    # log(t / lam) via a multiply (no per-element divide).
    log_ratio = jnp.log(t * inv_lam)                    # EUP: log
    pow_k = jnp.exp(k * log_ratio)                      # EUP: exp  -> (t/lam)^k
    # f = (k/lam) * (t/lam)^(k-1) * exp(-(t/lam)^k)
    #   = exp(log(k/lam) + (k-1)*log(t/lam) - (t/lam)^k)
    f = jnp.exp(log_k_over_lam + (k - 1.0) * log_ratio - pow_k)  # EUP: exp
    o_ref[...] = f.astype(o_ref.dtype)


def survival_forward(t, k, lam, *, block_b=512):
    """t: [B, P], k: [1, P], lam: [1, P] -> f: [B, P] (Weibull pdf)."""
    B, P = t.shape
    assert k.shape == (1, P) and lam.shape == (1, P)
    out_dtype = t.dtype

    # ---- Lane-dense planes: pad P up to a multiple of 128 with safe values.
    P_pad = ((P + 127) // 128) * 128
    if P_pad != P:
        pad = ((0, 0), (0, P_pad - P))
        t = jnp.pad(t, pad, constant_values=1.0)
        k = jnp.pad(k, pad, constant_values=1.0)
        lam = jnp.pad(lam, pad, constant_values=1.0)

    # ---- Hoist per-plane math out of the per-element path (tiny [1, P] ops).
    k_f = k.astype(jnp.float32)
    inv_lam = 1.0 / lam.astype(jnp.float32)
    log_k_over_lam = jnp.log(k_f * inv_lam)

    # ---- Batch tiling: multiple of 8 rows, capped so double-buffered
    #      in+out tiles stay well under the scoped VMEM limit on every gen
    #      (v7x has only 64 MiB physical / 32 MiB scoped default).
    itemsize = jnp.dtype(out_dtype).itemsize
    max_tile_bytes = 4 * 1024 * 1024            # per-buffer budget
    rows_budget = max(8, max_tile_bytes // (P_pad * max(itemsize, 4)))
    TB = min(B, block_b, rows_budget)
    if TB < B:
        TB = max(8, (TB // 8) * 8)              # keep (8,128) alignment
    grid = (pl.cdiv(B, TB),)

    cost = pl.CostEstimate(
        flops=5 * B * P_pad,
        transcendentals=3 * B * P_pad,
        bytes_accessed=B * P_pad * (itemsize + itemsize) + 3 * P_pad * 4,
    )

    out = pl.pallas_call(
        _weibull_kernel,
        out_shape=jax.ShapeDtypeStruct((B, P_pad), out_dtype),
        grid=grid,
        in_specs=[
            pl.BlockSpec((TB, P_pad), lambda i: (i, 0)),   # t  (batch-tiled)
            pl.BlockSpec((1, P_pad), lambda i: (0, 0)),    # k
            pl.BlockSpec((1, P_pad), lambda i: (0, 0)),    # 1/lam
            pl.BlockSpec((1, P_pad), lambda i: (0, 0)),    # log(k/lam)
        ],
        out_specs=pl.BlockSpec((TB, P_pad), lambda i: (i, 0)),
        compiler_params=pltpu.CompilerParams(
            dimension_semantics=("parallel",),
        ),
        cost_estimate=cost,
    )(t, k_f, inv_lam, log_k_over_lam)

    if P_pad != P:
        out = out[:, :P]
    return out


def survival_reference(t, k, lam):
    return k / lam * (t / lam) ** (k - 1.0) * jnp.exp(-((t / lam) ** k))


if __name__ == "__main__":
    planes = 32
    batch = 4

    key = jax.random.PRNGKey(0)
    k_key, lam_key, t_key = jax.random.split(key, 3)

    # Parameters mimic torch.rand(planes).view([1, -1]) (uniform in [0, 1)).
    # Shift slightly away from 0 to keep the pdf numerically well-behaved.
    k_param = jax.random.uniform(k_key, (1, planes), jnp.float32,
                                 minval=0.1, maxval=1.0)
    lam_param = jax.random.uniform(lam_key, (1, planes), jnp.float32,
                                   minval=0.1, maxval=1.0)

    # Input t (positive, as expected by the Weibull pdf).
    t = jax.random.uniform(t_key, (batch, planes), jnp.float32,
                           minval=0.5, maxval=1.5)

    out = survival_forward(t, k_param, lam_param)
    jax.block_until_ready(out)

    ref = survival_reference(t, k_param, lam_param)
    assert out.shape == (batch, planes)
    assert jnp.allclose(out, ref, rtol=1e-5, atol=1e-5), "mismatch vs reference"

    print("KERNEL_OK")
</pallas_src>

<mosaic_0001>
module attributes {stable_mosaic.version = 11 : i64} {
  func.func @_weibull_kernel(%arg0: i32, %arg1: memref<4x128xf32, #tpu.memory_space<vmem>>, %arg2: memref<1x128xf32, #tpu.memory_space<vmem>>, %arg3: memref<1x128xf32, #tpu.memory_space<vmem>>, %arg4: memref<1x128xf32, #tpu.memory_space<vmem>>, %arg5: memref<4x128xf32, #tpu.memory_space<vmem>>) attributes {dimension_semantics = [#tpu.dimension_semantics<parallel>], iteration_bounds = array<i64: 1>, scalar_prefetch = 0 : i64, scratch_operands = 0 : i64, tpu.core_type = #tpu.core_type<tc>, window_params = [{transform_indices = @transform_0, window_bounds = array<i64: 4, 128>}, {pipeline_mode = #tpu.pipeline_mode<synchronous>, transform_indices = @transform_1, window_bounds = array<i64: 1, 128>}, {pipeline_mode = #tpu.pipeline_mode<synchronous>, transform_indices = @transform_2, window_bounds = array<i64: 1, 128>}, {pipeline_mode = #tpu.pipeline_mode<synchronous>, transform_indices = @transform_3, window_bounds = array<i64: 1, 128>}, {transform_indices = @transform_4, window_bounds = array<i64: 4, 128>}]} {
    %c0 = arith.constant 0 : index
    %c0_0 = arith.constant 0 : index
    %0 = vector.load %arg1[%c0, %c0_0] : memref<4x128xf32, #tpu.memory_space<vmem>>, vector<4x128xf32>
    %c0_1 = arith.constant 0 : index
    %c0_2 = arith.constant 0 : index
    %1 = vector.load %arg2[%c0_1, %c0_2] : memref<1x128xf32, #tpu.memory_space<vmem>>, vector<1x128xf32>
    %c0_3 = arith.constant 0 : index
    %c0_4 = arith.constant 0 : index
    %2 = vector.load %arg3[%c0_3, %c0_4] : memref<1x128xf32, #tpu.memory_space<vmem>>, vector<1x128xf32>
    %c0_5 = arith.constant 0 : index
    %c0_6 = arith.constant 0 : index
    %3 = vector.load %arg4[%c0_5, %c0_6] : memref<1x128xf32, #tpu.memory_space<vmem>>, vector<1x128xf32>
    %4 = vector.broadcast %2 : vector<1x128xf32> to vector<4x128xf32>
    %5 = arith.mulf %0, %4 : vector<4x128xf32>
    %6 = math.log %5 : vector<4x128xf32>
    %7 = vector.broadcast %1 : vector<1x128xf32> to vector<4x128xf32>
    %8 = arith.mulf %7, %6 : vector<4x128xf32>
    %9 = math.exp %8 : vector<4x128xf32>
    %cst = arith.constant 1.000000e+00 : f32
    %10 = vector.broadcast %cst : f32 to vector<1x128xf32>
    %11 = arith.subf %1, %10 : vector<1x128xf32>
    %12 = vector.broadcast %11 : vector<1x128xf32> to vector<4x128xf32>
    %13 = arith.mulf %12, %6 : vector<4x128xf32>
    %14 = vector.broadcast %3 : vector<1x128xf32> to vector<4x128xf32>
    %15 = arith.addf %14, %13 : vector<4x128xf32>
    %16 = arith.subf %15, %9 : vector<4x128xf32>
    %17 = math.exp %16 : vector<4x128xf32>
    %c0_7 = arith.constant 0 : index
    %c0_8 = arith.constant 0 : index
    %18 = vector.load %arg5[%c0_7, %c0_8] : memref<4x128xf32, #tpu.memory_space<vmem>>, vector<4x128xf32>
    tpu.vector_store %arg5[%c0_7, %c0_8], %17 {strides = array<i32>} : memref<4x128xf32, #tpu.memory_space<vmem>>, vector<4x128xf32>,
    return
  }
  func.func @transform_0(%arg0: i32) -> (i32, i32) {
    %c0_i32 = arith.constant 0 : i32
    %c0_i32_0 = arith.constant 0 : i32
    return %arg0, %c0_i32 : i32, i32
  }
  func.func @transform_1(%arg0: i32) -> (i32, i32) {
    %c0_i32 = arith.constant 0 : i32
    %c0_i32_0 = arith.constant 0 : i32
    %c0_i32_1 = arith.constant 0 : i32
    return %c0_i32, %c0_i32_0 : i32, i32
  }
  func.func @transform_2(%arg0: i32) -> (i32, i32) {
    %c0_i32 = arith.constant 0 : i32
    %c0_i32_0 = arith.constant 0 : i32
    %c0_i32_1 = arith.constant 0 : i32
    return %c0_i32, %c0_i32_0 : i32, i32
  }
  func.func @transform_3(%arg0: i32) -> (i32, i32) {
    %c0_i32 = arith.constant 0 : i32
    %c0_i32_0 = arith.constant 0 : i32
    %c0_i32_1 = arith.constant 0 : i32
    return %c0_i32, %c0_i32_0 : i32, i32
  }
  func.func @transform_4(%arg0: i32) -> (i32, i32) {
    %c0_i32 = arith.constant 0 : i32
    %c0_i32_0 = arith.constant 0 : i32
    return %arg0, %c0_i32 : i32, i32
  }
}

</mosaic_0001>

<bundles_post_ra>
// kernel: tpu_custom_call.1
= control target key start
LH: loop header
LB: loop body
LE: loop exit
PB: predicated region body
PF: predicated region fallthrough
CT: control target
= control target key end

     0   :  { %9 = vsyncpa [#allocation3], 0  ;;  %s205_s0 = inlined_call_operand.hbm [shape: f32[4,128], index: 0, kind: input, shape index: {}]   ;;  %s206_s1 = inlined_call_operand.vmem [shape: f32[1,128], index: 1, kind: input, shape index: {}]   ;;  %s207_s2 = inlined_call_operand.vmem [shape: f32[1,128], index: 2, kind: input, shape index: {}]   ;;  %s208_s3 = inlined_call_operand.vmem [shape: f32[1,128], index: 3, kind: input, shape index: {}]   ;;  %s209_s4 = inlined_call_operand.hbm [shape: f32[4,128], index: 4, kind: output, shape index: {}]  }
   0x1   :  { %10 = vsyncpa [#allocation4], 0  ;;  %s145_s15 = smov [#allocation2]   ;;  %s97_s19 = scalar_lea.hbm %s205_s0, 64 }
   0x2   :  { %s17_s16 = sshll.u32 %s145_s15, 4  ;;  %p98_p0 = scmp.ne.s32.totalorder %s205_s0, %s97_s19  ;;  %s18_s16 = int_to_ptr.vmem [resolvable:$true] %s17_s16 }
   0x3   :  { %p101_p1 = scmp.lt.u32.totalorder %s97_s19, %s205_s0 }
   0x5   :  { %p103_p2 = pnand %p101_p1, %p98_p0 }
   0x7   :  { %106 = shalt.err (!%p103_p2)
}
   0x8   :  { %s107_s24 = scalar_lea.vmem %s18_s16, 64  ;;  %p112_p4 = scmp.lt.s32.totalorder %s18_s16, %s18_s16 }
   0x9   :  { %p108_p3 = scmp.ne.s32.totalorder %s18_s16, %s107_s24  ;;  %p113_p5 = scmp.lt.s32.totalorder %s107_s24, %s107_s24 }
   0xb   :  { %p114_p6 = por %p113_p5, %p112_p4 }
   0xd   :  { %p115_p7 = pnand %p114_p6, %p108_p3 }
   0xf   :  { %118 = shalt.err (!%p115_p7)
}
  0x10   :  { %20 = dma.hbm_to_vmem [thread:$0]  %s205_s0, 64, %s18_s16, [#allocation3]  }
  0x11   :  { %141 = dma.done.wait [#allocation3], 64  }
  0x12   :  { %142 = vsyncadd [#allocation3], 4294967232  ;;  %v30_v0 = vld [vmem:[#allocation2] sm:$0xf]  ;;  %v44_v2 = vlaneseq  ;;  %s146_s5 = smov [#allocation5]  }
  0x13   :  { %v86_v1 = vld [vmem:[%s207_s2] ss:$0 sm:$0xff] }
  0x14   :  { %v40_v3 = vmul.f32 %v86_v1, %v30_v0  ;;  %v45_v4 = vshrl.u32 %v44_v2, 7  ;;  %v31_v6 = vld [vmem:[%s206_s1] sm:$0x1]  ;;  %s77_s1 = sshll.u32 %s146_s5, 4  ;;  %s78_s1 = int_to_ptr.vmem [resolvable:$true] %s77_s1 }
  0x15   :  { %v87_v10 = vadd.f32 -1.0, %v31_v6  ;;  %v88_v15 = vld [vmem:[%s208_s3] ss:$0 sm:$0xff]  ;;  %s119_s6 = scalar_lea.vmem %s78_s1, 64  ;;  %p124_p9 = scmp.lt.s32.totalorder %s78_s1, %s78_s1 }
  0x16   :  { %91 = vlog2.f32 %v40_v3  ;;  %v46_v5 = vsub.s32 0, %v45_v4  ;;  %p120_p8 = scmp.ne.s32.totalorder %s78_s1, %s119_s6  ;;  %p125_p10 = scmp.lt.s32.totalorder %s119_s6, %s119_s6 }
  0x18   :  { %v47_v7 = vrot.slane %v31_v6, %v46_v5  ;;  %v57_v13 = vrot.slane %v87_v10, %v46_v5  ;;  %p126_p11 = por %p125_p10, %p124_p9 }
  0x1a   :  { %p127_p12 = pnand %p126_p11, %p120_p8 }
  0x20   :  { %v92_v8 = vpop.eup %91 }
  0x21   :  { %v42_v9 = vmul.f32 0.6931472, %v92_v8 }
  0x23   :  { %v49_v11 = vmul.f32 %v47_v7, %v42_v9  ;;  %v59_v14 = vmul.f32 %v57_v13, %v42_v9 }
  0x25   :  { %v50_v12 = vmul.f32 1.442695, %v49_v11  ;;  %v66_v16 = vadd.f32 %v88_v15, %v59_v14 }
  0x27   :  { %93 = vpow2.f32 %v50_v12 }
  0x31   :  { %v94_v17 = vpop.eup %93 }
  0x32   :  { %v67_v18 = vsub.f32 %v66_v16, %v94_v17 }
  0x34   :  { %v68_v19 = vmul.f32 1.442695, %v67_v18 }
  0x36   :  { %95 = vpow2.f32 %v68_v19 }
  0x40   :  { %v96_v20 = vpop.eup %95 }
  0x41   :  { %70 = vst [vmem:[#allocation5] sm:$0xf] %v96_v20 }
  0x42   :  { %130 = shalt.err (!%p127_p12)
}
  0x43   :  { %s131_s3 = scalar_lea.hbm %s209_s4, 64 }
  0x44   :  { %p132_p13 = scmp.ne.s32.totalorder %s209_s4, %s131_s3  ;;  %p135_p0 = scmp.lt.u32.totalorder %s131_s3, %s209_s4 }
  0x46   :  { %p137_p1 = pnand %p135_p0, %p132_p13 }
  0x48   :  { %140 = shalt.err (!%p137_p1)
}
  0x49   :  { %80 = dma.vmem_to_hbm [thread:$0]  %s78_s1, 64, %s209_s4, [#allocation4]  }
  0x4a   :  { %143 = dma.done.wait [#allocation4], 64  }
  0x4b   :  { %144 = vsyncadd [#allocation4], 4294967232 }
  0x4c   :  { %84 = vsyncpa [#allocation3], 1 }
  0x4d   :  { %85 = vsyncpa [#allocation4], 1 }

</bundles_post_ra>
